<compile_context>
chip_gen: v6e
topology: v6e:2x2x1
jax: 0.10.0
libtpu: 0.0.40
codegen_flags: <defaults>
</compile_context>

<pallas_src>
import jax
import jax.numpy as jnp
from jax import lax
from jax.experimental import pallas as pl
from jax.experimental.pallas import tpu as pltpu

ZDIM = 7
EPS = 1e-5                      # nn.LayerNorm default eps
LAYER_DIMS = [90, 64, 32, 16, ZDIM]
F_PAD = 128                     # input feature dim padded 90 -> 128 (lane-dense)
OUT_PAD = 128                   # output dim padded 7 -> 128 (lane-dense stores)
TB_MAX = 512                    # batch tile: multiple of 128 and 256 (MXU heights)


def _round_up(n, m):
    return ((n + m - 1) // m) * m


def _layernorm(h, gamma, beta):
    # PyTorch LayerNorm: biased variance over last dim + affine.
    mean = jnp.mean(h, axis=-1, keepdims=True)
    var = jnp.mean(jnp.square(h - mean), axis=-1, keepdims=True)
    return (h - mean) * lax.rsqrt(var + EPS) * gamma + beta


def encoder_kernel(x_ref,
                   w1_ref, b1_ref, g1_ref, be1_ref,
                   w2_ref, b2_ref, g2_ref, be2_ref,
                   w3_ref, b3_ref, g3_ref, be3_ref,
                   w4_ref, b4_ref,
                   o_ref):
    x = x_ref[...]                                     # (TB, 128) bf16

    h = jnp.dot(x, w1_ref[...], preferred_element_type=jnp.float32) + b1_ref[...]
    h = jnp.maximum(_layernorm(h, g1_ref[...], be1_ref[...]), 0.0)

    h = jnp.dot(h.astype(jnp.bfloat16), w2_ref[...],
                preferred_element_type=jnp.float32) + b2_ref[...]
    h = jnp.maximum(_layernorm(h, g2_ref[...], be2_ref[...]), 0.0)

    h = jnp.dot(h.astype(jnp.bfloat16), w3_ref[...],
                preferred_element_type=jnp.float32) + b3_ref[...]
    h = jnp.maximum(_layernorm(h, g3_ref[...], be3_ref[...]), 0.0)

    out = jnp.dot(h.astype(jnp.bfloat16), w4_ref[...],
                  preferred_element_type=jnp.float32) + b4_ref[...]
    o_ref[...] = out.astype(o_ref.dtype)               # (TB, 128) lane-dense store


def _resident_spec(shape):
    # Full-array block, constant block index -> stays VMEM-resident across the grid.
    return pl.BlockSpec(shape, lambda i: (0,) * len(shape))


def encoder_forward(x, params, tb_max=TB_MAX):
    """x: (B, 90) f32.  params: flat list
    [W1,b1,g1,beta1, W2,b2,g2,beta2, W3,b3,g3,beta3, W4,b4] at module shapes."""
    (W1, b1, g1, be1, W2, b2, g2, be2, W3, b3, g3, be3, W4, b4) = params
    B, f_in = x.shape
    assert f_in == LAYER_DIMS[0], f_in

    # --- batch tile choice (pad batch so there are no ragged tiles) ---------
    TB = tb_max if B >= tb_max else _round_up(max(B, 1), 8)
    Bp = _round_up(B, TB)

    # --- lane padding (pure layout plumbing; zeros do not change numerics) --
    x_p = jnp.pad(x, ((0, Bp - B), (0, F_PAD - f_in))).astype(jnp.bfloat16)
    W1p = jnp.pad(W1, ((0, F_PAD - f_in), (0, 0))).astype(jnp.bfloat16)
    W4p = jnp.pad(W4, ((0, 0), (0, OUT_PAD - ZDIM))).astype(jnp.bfloat16)
    b4p = jnp.pad(b4, ((0, 0), (0, OUT_PAD - ZDIM)))
    W2p = W2.astype(jnp.bfloat16)
    W3p = W3.astype(jnp.bfloat16)

    args = [x_p,
            W1p, b1, g1, be1,
            W2p, b2, g2, be2,
            W3p, b3, g3, be3,
            W4p, b4p]

    grid = (pl.cdiv(Bp, TB),)
    in_specs = [pl.BlockSpec((TB, F_PAD), lambda i: (i, 0))]
    in_specs += [_resident_spec(a.shape) for a in args[1:]]

    out = pl.pallas_call(
        encoder_kernel,
        out_shape=jax.ShapeDtypeStruct((Bp, OUT_PAD), jnp.float32),
        grid=grid,
        in_specs=in_specs,
        out_specs=pl.BlockSpec((TB, OUT_PAD), lambda i: (i, 0)),
        compiler_params=pltpu.CompilerParams(
            dimension_semantics=("parallel",)),
    )(*args)

    return out[:B, :ZDIM]


def init_params(key):
    """PyTorch-style init for the Linear layers; LayerNorm affine params are
    perturbed around (1, 0) so the affine path is actually exercised."""
    params = []
    for li in range(4):
        d_in, d_out = LAYER_DIMS[li], LAYER_DIMS[li + 1]
        key, kw, kb, kg, kbe = jax.random.split(key, 5)
        bound = 1.0 / jnp.sqrt(jnp.float32(d_in))
        W = jax.random.uniform(kw, (d_in, d_out), jnp.float32, -bound, bound)
        b = jax.random.uniform(kb, (1, d_out), jnp.float32, -bound, bound)
        params += [W, b]
        if li < 3:  # LayerNorm follows the first three Linear layers
            gamma = 1.0 + 0.1 * jax.random.normal(kg, (1, d_out), jnp.float32)
            beta = 0.1 * jax.random.normal(kbe, (1, d_out), jnp.float32)
            params += [gamma, beta]
    return params


def encoder_reference(x, params, matmul_dtype=jnp.float32):
    """Pure-JAX reference mirroring the PyTorch forward.  matmul_dtype=bfloat16
    reproduces the kernel's MXU precision for a tight comparison."""
    (W1, b1, g1, be1, W2, b2, g2, be2, W3, b3, g3, be3, W4, b4) = params

    def mm(a, w):
        return jnp.dot(a.astype(matmul_dtype), w.astype(matmul_dtype),
                       preferred_element_type=jnp.float32)

    h = jnp.maximum(_layernorm(mm(x, W1) + b1, g1, be1), 0.0)
    h = jnp.maximum(_layernorm(mm(h, W2) + b2, g2, be2), 0.0)
    h = jnp.maximum(_layernorm(mm(h, W3) + b3, g3, be3), 0.0)
    return mm(h, W4) + b4


if __name__ == "__main__":
    key = jax.random.PRNGKey(0)
    key, kx = jax.random.split(key)

    batch = 2  # NOTE: at batch=2 this is pure launch overhead; tiling pays off for large B.
    x = jax.random.normal(kx, (batch, 90), jnp.float32)
    params = init_params(key)

    out = encoder_forward(x, params)
    out = jax.block_until_ready(out)
    assert out.shape == (batch, ZDIM), out.shape

    # Tight check against a bf16-matmul-matched reference.
    ref_bf16 = encoder_reference(x, params, matmul_dtype=jnp.bfloat16)
    err_b = float(jnp.max(jnp.abs(out - ref_bf16)))
    assert jnp.allclose(out, ref_bf16, atol=5e-3, rtol=5e-3), (
        f"mismatch vs bf16-matched reference: max abs err = {err_b}")

    # Looser check against the full-f32 PyTorch-semantics reference.
    ref_f32 = encoder_reference(x, params, matmul_dtype=jnp.float32)
    err_f = float(jnp.max(jnp.abs(out - ref_f32)))
    assert jnp.allclose(out, ref_f32, atol=5e-2, rtol=5e-2), (
        f"mismatch vs f32 reference: max abs err = {err_f}")

    print("KERNEL_OK")
</pallas_src>

<mosaic_0001>
module attributes {stable_mosaic.version = 11 : i64} {
  func.func @encoder_kernel(%arg0: i32, %arg1: memref<8x128xbf16, #tpu.memory_space<vmem>>, %arg2: memref<128x64xbf16, #tpu.memory_space<vmem>>, %arg3: memref<1x64xf32, #tpu.memory_space<vmem>>, %arg4: memref<1x64xf32, #tpu.memory_space<vmem>>, %arg5: memref<1x64xf32, #tpu.memory_space<vmem>>, %arg6: memref<64x32xbf16, #tpu.memory_space<vmem>>, %arg7: memref<1x32xf32, #tpu.memory_space<vmem>>, %arg8: memref<1x32xf32, #tpu.memory_space<vmem>>, %arg9: memref<1x32xf32, #tpu.memory_space<vmem>>, %arg10: memref<32x16xbf16, #tpu.memory_space<vmem>>, %arg11: memref<1x16xf32, #tpu.memory_space<vmem>>, %arg12: memref<1x16xf32, #tpu.memory_space<vmem>>, %arg13: memref<1x16xf32, #tpu.memory_space<vmem>>, %arg14: memref<16x128xbf16, #tpu.memory_space<vmem>>, %arg15: memref<1x128xf32, #tpu.memory_space<vmem>>, %arg16: memref<8x128xf32, #tpu.memory_space<vmem>>) attributes {dimension_semantics = [#tpu.dimension_semantics<parallel>], iteration_bounds = array<i64: 1>, scalar_prefetch = 0 : i64, scratch_operands = 0 : i64, tpu.core_type = #tpu.core_type<tc>, window_params = [{transform_indices = @transform_0, window_bounds = array<i64: 8, 128>}, {pipeline_mode = #tpu.pipeline_mode<synchronous>, transform_indices = @transform_1, window_bounds = array<i64: 128, 64>}, {pipeline_mode = #tpu.pipeline_mode<synchronous>, transform_indices = @transform_2, window_bounds = array<i64: 1, 64>}, {pipeline_mode = #tpu.pipeline_mode<synchronous>, transform_indices = @transform_3, window_bounds = array<i64: 1, 64>}, {pipeline_mode = #tpu.pipeline_mode<synchronous>, transform_indices = @transform_4, window_bounds = array<i64: 1, 64>}, {pipeline_mode = #tpu.pipeline_mode<synchronous>, transform_indices = @transform_5, window_bounds = array<i64: 64, 32>}, {pipeline_mode = #tpu.pipeline_mode<synchronous>, transform_indices = @transform_6, window_bounds = array<i64: 1, 32>}, {pipeline_mode = #tpu.pipeline_mode<synchronous>, transform_indices = @transform_7, window_bounds = array<i64: 1, 32>}, {pipeline_mode = #tpu.pipeline_mode<synchronous>, transform_indices = @transform_8, window_bounds = array<i64: 1, 32>}, {pipeline_mode = #tpu.pipeline_mode<synchronous>, transform_indices = @transform_9, window_bounds = array<i64: 32, 16>}, {pipeline_mode = #tpu.pipeline_mode<synchronous>, transform_indices = @transform_10, window_bounds = array<i64: 1, 16>}, {pipeline_mode = #tpu.pipeline_mode<synchronous>, transform_indices = @transform_11, window_bounds = array<i64: 1, 16>}, {pipeline_mode = #tpu.pipeline_mode<synchronous>, transform_indices = @transform_12, window_bounds = array<i64: 1, 16>}, {pipeline_mode = #tpu.pipeline_mode<synchronous>, transform_indices = @transform_13, window_bounds = array<i64: 16, 128>}, {pipeline_mode = #tpu.pipeline_mode<synchronous>, transform_indices = @transform_14, window_bounds = array<i64: 1, 128>}, {transform_indices = @transform_15, window_bounds = array<i64: 8, 128>}]} {
    %c0 = arith.constant 0 : index
    %c0_0 = arith.constant 0 : index
    %0 = vector.load %arg1[%c0, %c0_0] : memref<8x128xbf16, #tpu.memory_space<vmem>>, vector<8x128xbf16>
    %c0_1 = arith.constant 0 : index
    %c0_2 = arith.constant 0 : index
    %1 = vector.load %arg2[%c0_1, %c0_2] : memref<128x64xbf16, #tpu.memory_space<vmem>>, vector<128x64xbf16>
    %cst = arith.constant dense<0.000000e+00> : vector<8x64xf32>
    %2 = tpu.matmul %0, %1, %cst {dimension_numbers = #tpu.dot_dimension_numbers<[1], [0], [0], [1], [0, 0, 1, 1], [], []>} : vector<8x128xbf16>, vector<128x64xbf16>, vector<8x64xf32> -> vector<8x64xf32>
    %c0_3 = arith.constant 0 : index
    %c0_4 = arith.constant 0 : index
    %3 = vector.load %arg3[%c0_3, %c0_4] : memref<1x64xf32, #tpu.memory_space<vmem>>, vector<1x64xf32>
    %4 = vector.broadcast %3 : vector<1x64xf32> to vector<8x64xf32>
    %5 = arith.addf %2, %4 : vector<8x64xf32>
    %c0_5 = arith.constant 0 : index
    %c0_6 = arith.constant 0 : index
    %6 = vector.load %arg4[%c0_5, %c0_6] : memref<1x64xf32, #tpu.memory_space<vmem>>, vector<1x64xf32>
    %c0_7 = arith.constant 0 : index
    %c0_8 = arith.constant 0 : index
    %7 = vector.load %arg5[%c0_7, %c0_8] : memref<1x64xf32, #tpu.memory_space<vmem>>, vector<1x64xf32>
    %cst_9 = arith.constant dense<0.000000e+00> : vector<8xf32>
    %8 = vector.multi_reduction <add>, %5, %cst_9 [1] : vector<8x64xf32> to vector<8xf32>
    %9 = vector.shape_cast %8 : vector<8xf32> to vector<8x1xf32>
    %cst_10 = arith.constant 6.400000e+01 : f32
    %10 = vector.broadcast %cst_10 : f32 to vector<8x1xf32>
    %11 = arith.divf %9, %10 : vector<8x1xf32>
    %12 = vector.broadcast %11 : vector<8x1xf32> to vector<8x64xf32>
    %13 = arith.subf %5, %12 : vector<8x64xf32>
    %14 = arith.mulf %13, %13 : vector<8x64xf32>
    %cst_11 = arith.constant dense<0.000000e+00> : vector<8xf32>
    %15 = vector.multi_reduction <add>, %14, %cst_11 [1] : vector<8x64xf32> to vector<8xf32>
    %16 = vector.shape_cast %15 : vector<8xf32> to vector<8x1xf32>
    %cst_12 = arith.constant 6.400000e+01 : f32
    %17 = vector.broadcast %cst_12 : f32 to vector<8x1xf32>
    %18 = arith.divf %16, %17 : vector<8x1xf32>
    %19 = vector.broadcast %11 : vector<8x1xf32> to vector<8x64xf32>
    %20 = arith.subf %5, %19 : vector<8x64xf32>
    %cst_13 = arith.constant 9.99999974E-6 : f32
    %21 = vector.broadcast %cst_13 : f32 to vector<8x1xf32>
    %22 = arith.addf %18, %21 : vector<8x1xf32>
    %23 = math.rsqrt %22 : vector<8x1xf32>
    %24 = vector.broadcast %23 : vector<8x1xf32> to vector<8x64xf32>
    %25 = arith.mulf %20, %24 : vector<8x64xf32>
    %26 = vector.broadcast %6 : vector<1x64xf32> to vector<8x64xf32>
    %27 = arith.mulf %25, %26 : vector<8x64xf32>
    %28 = vector.broadcast %7 : vector<1x64xf32> to vector<8x64xf32>
    %29 = arith.addf %27, %28 : vector<8x64xf32>
    %cst_14 = arith.constant 0.000000e+00 : f32
    %30 = vector.broadcast %cst_14 : f32 to vector<8x64xf32>
    %31 = arith.maximumf %29, %30 : vector<8x64xf32>
    %32 = arith.truncf %31 : vector<8x64xf32> to vector<8x64xbf16>
    %c0_15 = arith.constant 0 : index
    %c0_16 = arith.constant 0 : index
    %33 = vector.load %arg6[%c0_15, %c0_16] : memref<64x32xbf16, #tpu.memory_space<vmem>>, vector<64x32xbf16>
    %cst_17 = arith.constant dense<0.000000e+00> : vector<8x32xf32>
    %34 = tpu.matmul %32, %33, %cst_17 {dimension_numbers = #tpu.dot_dimension_numbers<[1], [0], [0], [1], [0, 0, 1, 1], [], []>} : vector<8x64xbf16>, vector<64x32xbf16>, vector<8x32xf32> -> vector<8x32xf32>
    %c0_18 = arith.constant 0 : index
    %c0_19 = arith.constant 0 : index
    %35 = vector.load %arg7[%c0_18, %c0_19] : memref<1x32xf32, #tpu.memory_space<vmem>>, vector<1x32xf32>
    %36 = vector.broadcast %35 : vector<1x32xf32> to vector<8x32xf32>
    %37 = arith.addf %34, %36 : vector<8x32xf32>
    %c0_20 = arith.constant 0 : index
    %c0_21 = arith.constant 0 : index
    %38 = vector.load %arg8[%c0_20, %c0_21] : memref<1x32xf32, #tpu.memory_space<vmem>>, vector<1x32xf32>
    %c0_22 = arith.constant 0 : index
    %c0_23 = arith.constant 0 : index
    %39 = vector.load %arg9[%c0_22, %c0_23] : memref<1x32xf32, #tpu.memory_space<vmem>>, vector<1x32xf32>
    %cst_24 = arith.constant dense<0.000000e+00> : vector<8xf32>
    %40 = vector.multi_reduction <add>, %37, %cst_24 [1] : vector<8x32xf32> to vector<8xf32>
    %41 = vector.shape_cast %40 : vector<8xf32> to vector<8x1xf32>
    %cst_25 = arith.constant 3.200000e+01 : f32
    %42 = vector.broadcast %cst_25 : f32 to vector<8x1xf32>
    %43 = arith.divf %41, %42 : vector<8x1xf32>
    %44 = vector.broadcast %43 : vector<8x1xf32> to vector<8x32xf32>
    %45 = arith.subf %37, %44 : vector<8x32xf32>
    %46 = arith.mulf %45, %45 : vector<8x32xf32>
    %cst_26 = arith.constant dense<0.000000e+00> : vector<8xf32>
    %47 = vector.multi_reduction <add>, %46, %cst_26 [1] : vector<8x32xf32> to vector<8xf32>
    %48 = vector.shape_cast %47 : vector<8xf32> to vector<8x1xf32>
    %cst_27 = arith.constant 3.200000e+01 : f32
    %49 = vector.broadcast %cst_27 : f32 to vector<8x1xf32>
    %50 = arith.divf %48, %49 : vector<8x1xf32>
    %51 = vector.broadcast %43 : vector<8x1xf32> to vector<8x32xf32>
    %52 = arith.subf %37, %51 : vector<8x32xf32>
    %cst_28 = arith.constant 9.99999974E-6 : f32
    %53 = vector.broadcast %cst_28 : f32 to vector<8x1xf32>
    %54 = arith.addf %50, %53 : vector<8x1xf32>
    %55 = math.rsqrt %54 : vector<8x1xf32>
    %56 = vector.broadcast %55 : vector<8x1xf32> to vector<8x32xf32>
    %57 = arith.mulf %52, %56 : vector<8x32xf32>
    %58 = vector.broadcast %38 : vector<1x32xf32> to vector<8x32xf32>
    %59 = arith.mulf %57, %58 : vector<8x32xf32>
    %60 = vector.broadcast %39 : vector<1x32xf32> to vector<8x32xf32>
    %61 = arith.addf %59, %60 : vector<8x32xf32>
    %cst_29 = arith.constant 0.000000e+00 : f32
    %62 = vector.broadcast %cst_29 : f32 to vector<8x32xf32>
    %63 = arith.maximumf %61, %62 : vector<8x32xf32>
    %64 = arith.truncf %63 : vector<8x32xf32> to vector<8x32xbf16>
    %c0_30 = arith.constant 0 : index
    %c0_31 = arith.constant 0 : index
    %65 = vector.load %arg10[%c0_30, %c0_31] : memref<32x16xbf16, #tpu.memory_space<vmem>>, vector<32x16xbf16>
    %cst_32 = arith.constant dense<0.000000e+00> : vector<8x16xf32>
    %66 = tpu.matmul %64, %65, %cst_32 {dimension_numbers = #tpu.dot_dimension_numbers<[1], [0], [0], [1], [0, 0, 1, 1], [], []>} : vector<8x32xbf16>, vector<32x16xbf16>, vector<8x16xf32> -> vector<8x16xf32>
    %c0_33 = arith.constant 0 : index
    %c0_34 = arith.constant 0 : index
    %67 = vector.load %arg11[%c0_33, %c0_34] : memref<1x16xf32, #tpu.memory_space<vmem>>, vector<1x16xf32>
    %68 = vector.broadcast %67 : vector<1x16xf32> to vector<8x16xf32>
    %69 = arith.addf %66, %68 : vector<8x16xf32>
    %c0_35 = arith.constant 0 : index
    %c0_36 = arith.constant 0 : index
    %70 = vector.load %arg12[%c0_35, %c0_36] : memref<1x16xf32, #tpu.memory_space<vmem>>, vector<1x16xf32>
    %c0_37 = arith.constant 0 : index
    %c0_38 = arith.constant 0 : index
    %71 = vector.load %arg13[%c0_37, %c0_38] : memref<1x16xf32, #tpu.memory_space<vmem>>, vector<1x16xf32>
    %cst_39 = arith.constant dense<0.000000e+00> : vector<8xf32>
    %72 = vector.multi_reduction <add>, %69, %cst_39 [1] : vector<8x16xf32> to vector<8xf32>
    %73 = vector.shape_cast %72 : vector<8xf32> to vector<8x1xf32>
    %cst_40 = arith.constant 1.600000e+01 : f32
    %74 = vector.broadcast %cst_40 : f32 to vector<8x1xf32>
    %75 = arith.divf %73, %74 : vector<8x1xf32>
    %76 = vector.broadcast %75 : vector<8x1xf32> to vector<8x16xf32>
    %77 = arith.subf %69, %76 : vector<8x16xf32>
    %78 = arith.mulf %77, %77 : vector<8x16xf32>
    %cst_41 = arith.constant dense<0.000000e+00> : vector<8xf32>
    %79 = vector.multi_reduction <add>, %78, %cst_41 [1] : vector<8x16xf32> to vector<8xf32>
    %80 = vector.shape_cast %79 : vector<8xf32> to vector<8x1xf32>
    %cst_42 = arith.constant 1.600000e+01 : f32
    %81 = vector.broadcast %cst_42 : f32 to vector<8x1xf32>
    %82 = arith.divf %80, %81 : vector<8x1xf32>
    %83 = vector.broadcast %75 : vector<8x1xf32> to vector<8x16xf32>
    %84 = arith.subf %69, %83 : vector<8x16xf32>
    %cst_43 = arith.constant 9.99999974E-6 : f32
    %85 = vector.broadcast %cst_43 : f32 to vector<8x1xf32>
    %86 = arith.addf %82, %85 : vector<8x1xf32>
    %87 = math.rsqrt %86 : vector<8x1xf32>
    %88 = vector.broadcast %87 : vector<8x1xf32> to vector<8x16xf32>
    %89 = arith.mulf %84, %88 : vector<8x16xf32>
    %90 = vector.broadcast %70 : vector<1x16xf32> to vector<8x16xf32>
    %91 = arith.mulf %89, %90 : vector<8x16xf32>
    %92 = vector.broadcast %71 : vector<1x16xf32> to vector<8x16xf32>
    %93 = arith.addf %91, %92 : vector<8x16xf32>
    %cst_44 = arith.constant 0.000000e+00 : f32
    %94 = vector.broadcast %cst_44 : f32 to vector<8x16xf32>
    %95 = arith.maximumf %93, %94 : vector<8x16xf32>
    %96 = arith.truncf %95 : vector<8x16xf32> to vector<8x16xbf16>
    %c0_45 = arith.constant 0 : index
    %c0_46 = arith.constant 0 : index
    %97 = vector.load %arg14[%c0_45, %c0_46] : memref<16x128xbf16, #tpu.memory_space<vmem>>, vector<16x128xbf16>
    %cst_47 = arith.constant dense<0.000000e+00> : vector<8x128xf32>
    %98 = tpu.matmul %96, %97, %cst_47 {dimension_numbers = #tpu.dot_dimension_numbers<[1], [0], [0], [1], [0, 0, 1, 1], [], []>} : vector<8x16xbf16>, vector<16x128xbf16>, vector<8x128xf32> -> vector<8x128xf32>
    %c0_48 = arith.constant 0 : index
    %c0_49 = arith.constant 0 : index
    %99 = vector.load %arg15[%c0_48, %c0_49] : memref<1x128xf32, #tpu.memory_space<vmem>>, vector<1x128xf32>
    %100 = vector.broadcast %99 : vector<1x128xf32> to vector<8x128xf32>
    %101 = arith.addf %98, %100 : vector<8x128xf32>
    %c0_50 = arith.constant 0 : index
    %c0_51 = arith.constant 0 : index
    %102 = vector.load %arg16[%c0_50, %c0_51] : memref<8x128xf32, #tpu.memory_space<vmem>>, vector<8x128xf32>
    tpu.vector_store %arg16[%c0_50, %c0_51], %101 {strides = array<i32>} : memref<8x128xf32, #tpu.memory_space<vmem>>, vector<8x128xf32>,
    return
  }
  func.func @transform_0(%arg0: i32) -> (i32, i32) {
    %c0_i32 = arith.constant 0 : i32
    %c0_i32_0 = arith.constant 0 : i32
    return %arg0, %c0_i32 : i32, i32
  }
  func.func @transform_1(%arg0: i32) -> (i32, i32) {
    %c0_i32 = arith.constant 0 : i32
    %c0_i32_0 = arith.constant 0 : i32
    %c0_i32_1 = arith.constant 0 : i32
    return %c0_i32, %c0_i32_0 : i32, i32
  }
  func.func @transform_2(%arg0: i32) -> (i32, i32) {
    %c0_i32 = arith.constant 0 : i32
    %c0_i32_0 = arith.constant 0 : i32
    %c0_i32_1 = arith.constant 0 : i32
    return %c0_i32, %c0_i32_0 : i32, i32
  }
  func.func @transform_3(%arg0: i32) -> (i32, i32) {
    %c0_i32 = arith.constant 0 : i32
    %c0_i32_0 = arith.constant 0 : i32
    %c0_i32_1 = arith.constant 0 : i32
    return %c0_i32, %c0_i32_0 : i32, i32
  }
  func.func @transform_4(%arg0: i32) -> (i32, i32) {
    %c0_i32 = arith.constant 0 : i32
    %c0_i32_0 = arith.constant 0 : i32
    %c0_i32_1 = arith.constant 0 : i32
    return %c0_i32, %c0_i32_0 : i32, i32
  }
  func.func @transform_5(%arg0: i32) -> (i32, i32) {
    %c0_i32 = arith.constant 0 : i32
    %c0_i32_0 = arith.constant 0 : i32
    %c0_i32_1 = arith.constant 0 : i32
    return %c0_i32, %c0_i32_0 : i32, i32
  }
  func.func @transform_6(%arg0: i32) -> (i32, i32) {
    %c0_i32 = arith.constant 0 : i32
    %c0_i32_0 = arith.constant 0 : i32
    %c0_i32_1 = arith.constant 0 : i32
    return %c0_i32, %c0_i32_0 : i32, i32
  }
  func.func @transform_7(%arg0: i32) -> (i32, i32) {
    %c0_i32 = arith.constant 0 : i32
    %c0_i32_0 = arith.constant 0 : i32
    %c0_i32_1 = arith.constant 0 : i32
    return %c0_i32, %c0_i32_0 : i32, i32
  }
  func.func @transform_8(%arg0: i32) -> (i32, i32) {
    %c0_i32 = arith.constant 0 : i32
    %c0_i32_0 = arith.constant 0 : i32
    %c0_i32_1 = arith.constant 0 : i32
    return %c0_i32, %c0_i32_0 : i32, i32
  }
  func.func @transform_9(%arg0: i32) -> (i32, i32) {
    %c0_i32 = arith.constant 0 : i32
    %c0_i32_0 = arith.constant 0 : i32
    %c0_i32_1 = arith.constant 0 : i32
    return %c0_i32, %c0_i32_0 : i32, i32
  }
  func.func @transform_10(%arg0: i32) -> (i32, i32) {
    %c0_i32 = arith.constant 0 : i32
    %c0_i32_0 = arith.constant 0 : i32
    %c0_i32_1 = arith.constant 0 : i32
    return %c0_i32, %c0_i32_0 : i32, i32
  }
  func.func @transform_11(%arg0: i32) -> (i32, i32) {
    %c0_i32 = arith.constant 0 : i32
    %c0_i32_0 = arith.constant 0 : i32
    %c0_i32_1 = arith.constant 0 : i32
    return %c0_i32, %c0_i32_0 : i32, i32
  }
  func.func @transform_12(%arg0: i32) -> (i32, i32) {
    %c0_i32 = arith.constant 0 : i32
    %c0_i32_0 = arith.constant 0 : i32
    %c0_i32_1 = arith.constant 0 : i32
    return %c0_i32, %c0_i32_0 : i32, i32
  }
  func.func @transform_13(%arg0: i32) -> (i32, i32) {
    %c0_i32 = arith.constant 0 : i32
    %c0_i32_0 = arith.constant 0 : i32
    %c0_i32_1 = arith.constant 0 : i32
    return %c0_i32, %c0_i32_0 : i32, i32
  }
  func.func @transform_14(%arg0: i32) -> (i32, i32) {
    %c0_i32 = arith.constant 0 : i32
    %c0_i32_0 = arith.constant 0 : i32
    %c0_i32_1 = arith.constant 0 : i32
    return %c0_i32, %c0_i32_0 : i32, i32
  }
  func.func @transform_15(%arg0: i32) -> (i32, i32) {
    %c0_i32 = arith.constant 0 : i32
    %c0_i32_0 = arith.constant 0 : i32
    return %arg0, %c0_i32 : i32, i32
  }
}

</mosaic_0001>

<bundles_post_ra>
// kernel: tpu_custom_call.1
= control target key start
LH: loop header
LB: loop body
LE: loop exit
PB: predicated region body
PF: predicated region fallthrough
CT: control target
= control target key end

     0   :  { %v623_v1 = vmov 0.0   ;;  %vm624_vm0 = vmmov 0   ;;  %s819_s0 = inlined_call_operand.vmem [shape: bf16[8,128], index: 0, kind: input, shape index: {}]   ;;  %s820_s1 = inlined_call_operand.vmem [shape: bf16[128,64], index: 1, kind: input, shape index: {}]   ;;  %s821_s2 = inlined_call_operand.vmem [shape: f32[1,64], index: 2, kind: input, shape index: {}]   ;;  %s822_s3 = inlined_call_operand.vmem [shape: f32[1,64], index: 3, kind: input, shape index: {}]   ;;  %s823_s4 = inlined_call_operand.vmem [shape: f32[1,64], index: 4, kind: input, shape index: {}]   ;;  %s824_s5 = inlined_call_operand.vmem [shape: bf16[64,32], index: 5, kind: input, shape index: {}]   ;;  %s825_s6 = inlined_call_operand.vmem [shape: f32[1,32], index: 6, kind: input, shape index: {}]   ;;  %s826_s7 = inlined_call_operand.vmem [shape: f32[1,32], index: 7, kind: input, shape index: {}]   ;;  %s827_s8 = inlined_call_operand.vmem [shape: f32[1,32], index: 8, kind: input, shape index: {}]   ;;  %s828_s9 = inlined_call_operand.vmem [shape: bf16[32,16], index: 9, kind: input, shape index: {}]   ;;  %s829_s10 = inlined_call_operand.vmem [shape: f32[1,16], index: 10, kind: input, shape index: {}]   ;;  %s830_s11 = inlined_call_operand.vmem [shape: f32[1,16], index: 11, kind: input, shape index: {}]   ;;  %s831_s12 = inlined_call_operand.vmem [shape: f32[1,16], index: 12, kind: input, shape index: {}]   ;;  %s832_s13 = inlined_call_operand.vmem [shape: bf16[16,128], index: 13, kind: input, shape index: {}]   ;;  %s833_s14 = inlined_call_operand.vmem [shape: f32[1,128], index: 14, kind: input, shape index: {}]   ;;  %s834_s15 = inlined_call_operand.hbm [shape: f32[8,128], index: 15, kind: output, shape index: {}]  }
   0x1   :  { %v580_v0 = vld [vmem:[%s820_s1 + $0x38] sm:$0xff]   ;;  %531 = vmatprep.subr.bf16.mxu0 %v623_v1  ;;  %551 = vmatprep.subr.bf16.mxu1 %v623_v1  ;;  %v581_v2 = vld [vmem:[%s820_s1 + $0x30] sm:$0xff]   ;;  %v582_v3 = vld [vmem:[%s820_s1 + $0x28] sm:$0xff]  }
   0x2   :  { %532 = vmatpush3.bf16.msra.mxu0 %v580_v0  ;;  %547 = vmatprep.mubr.msk.bf16.mxu0 %vm624_vm0, %v623_v1  ;;  %v583_v4 = vld [vmem:[%s820_s1 + $0x20] sm:$0xff]  }
   0x3   :  { %533 = vmatprep.subr.bf16.mxu0 %v623_v1  ;;  %559 = vmatprep.mubr.msk.bf16.mxu1 %vm624_vm0, %v623_v1 }
   0x6   :  { %534 = vmatpush3.bf16.msra.mxu0 %v581_v2 }
   0x7   :  { %535 = vmatprep.subr.bf16.mxu0 %v623_v1 }
   0xa   :  { %536 = vmatpush3.bf16.msra.mxu0 %v582_v3 }
   0xb   :  { %537 = vmatprep.subr.bf16.mxu0 %v623_v1 }
   0xc   :  { %20 = vsyncpa [#allocation3], 0  ;;  %v584_v5 = vld [vmem:[%s820_s1 + $0x18] sm:$0xff]   ;;  %v585_v6 = vld [vmem:[%s820_s1 + $0x10] sm:$0xff]   ;;  %vm166_vm1 = vcmask 523264   ;;  %vm281_vm2 = vcmask 261120  }
   0xd   :  { %v586_v7 = vld [vmem:[%s820_s1 + $0x8] sm:$0xff]   ;;  %v587_v8 = vld [vmem:[%s820_s1] sm:$0xff]   ;;  %v588_v22 = vld [vmem:[%s824_s5 + $0x18] sm:$0xff]   ;;  %vm380_vm3 = vcmask 130048   ;;  %s625_s25 = smov [#allocation2]  }
   0xe   :  { %538 = vmatpush3.bf16.msra.mxu0 %v583_v4  ;;  %v52_v9 = vld [vmem:[%s819_s0] sm:$0xf]  ;;  %552 = vmatpush3.bf16.msra.mxu1 %v588_v22  ;;  %v589_v23 = vld [vmem:[%s824_s5 + $0x10] sm:$0xff]   ;;  %v590_v24 = vld [vmem:[%s824_s5 + $0x8] sm:$0xff]   ;;  %s476_s26 = sshll.u32 %s625_s25, 4  ;;  %s477_s26 = int_to_ptr.vmem [resolvable:$true] %s476_s26 }
   0xf   :  { %539 = vmatprep.subr.bf16.mxu0 %v623_v1  ;;  %v484_v10 = vld [vmem:[%s821_s2] ss:$0 sm:$0xff]  ;;  %553 = vmatprep.subr.bf16.mxu1 %v623_v1  ;;  %v592_v49 = vld [vmem:[%s828_s9 + $0x8] sm:$0xff]   ;;  %p606_p1 = scmp.lt.s32.totalorder %s477_s26, %s477_s26 }
  0x10   :  { %v591_v25 = vld [vmem:[%s824_s5] sm:$0xff]  }
  0x11   :  { %v493_v30 = vld [vmem:[%s822_s3] ss:$0 sm:$0xff] }
  0x12   :  { %540 = vmatpush3.bf16.msra.mxu0 %v584_v5  ;;  %554 = vmatpush3.bf16.msra.mxu1 %v589_v23  ;;  %v494_v32 = vld [vmem:[%s823_s4] ss:$0 sm:$0xff] }
  0x13   :  { %541 = vmatprep.subr.bf16.mxu0 %v623_v1  ;;  %555 = vmatprep.subr.bf16.mxu1 %v623_v1  ;;  %v495_v37 = vld [vmem:[%s825_s6] ss:$0 sm:$0xff] }
  0x14   :  { %v593_v50 = vld [vmem:[%s828_s9] sm:$0xff]  }
  0x15   :  { %v501_v55 = vld [vmem:[%s826_s7] ss:$0 sm:$0xff] }
  0x16   :  { %542 = vmatpush3.bf16.msra.mxu0 %v585_v6  ;;  %556 = vmatpush3.bf16.msra.mxu1 %v590_v24  ;;  %v502_v57 = vld [vmem:[%s827_s8] ss:$0 sm:$0xff] }
  0x17   :  { %543 = vmatprep.subr.bf16.mxu0 %v623_v1  ;;  %557 = vmatprep.subr.bf16.mxu1 %v623_v1  ;;  %v503_v62 = vld [vmem:[%s829_s10] ss:$0 sm:$0xff] }
  0x18   :  { %v509_v22 = vld [vmem:[%s833_s14] ss:$0 sm:$0xff] }
  0x1a   :  { %544 = vmatpush3.bf16.msra.mxu0 %v586_v7  ;;  %558 = vmatpush3.bf16.msra.mxu1 %v591_v25 }
  0x1b   :  { %545 = vmatprep.subr.bf16.mxu0 %v623_v1  ;;  %563 = vmatprep.subr.bf16.mxu1 %v623_v1 }
  0x1e   :  { %546 = vmatpush3.bf16.msra.mxu0 %v587_v8 }
  0x21   :  { %548 = vmatmul.mubr.bf16.vlgmr.msra.gmra.mxu0 %v52_v9 }
  0xe1   :  { %v158_v11 = vpop.f32.mrf.mxu0 }
  0xe2   :  { %v159_v12 = vadd.f32 %v484_v10, %v158_v11 }
  0xe3   :  { %v549_v13 = vpop.f32.mrf.mxu0 }
  0xe4   :  { %v167_v14 = vsel %vm166_vm1, %v159_v12, 0.0 }
  0xe5   :  { %168 = vadd.xlane.f32.xlu0 %v167_v14  ;;  %v161_v15 = vpop.f32.mrf.mxu0 }
  0xe6   :  { %v507_v15 = vld [vmem:[%s830_s11] ss:$0 sm:$0xff]  ;;  %s601_s11 = scalar_lea.vmem %s477_s26, 128 }
  0xe7   :  { %v550_v16 = vpop.f32.mrf.mxu0  ;;  %p602_p0 = scmp.ne.s32.totalorder %s477_s26, %s601_s11  ;;  %p607_p2 = scmp.lt.s32.totalorder %s601_s11, %s601_s11 }
  0xe9   :  { %p608_p3 = por %p607_p2, %p606_p1 }
  0xeb   :  { %p609_p4 = pnand %p608_p3, %p602_p0 }
 0x16e   :  { %v169_v17 = vpop.xlane.xlu0 %168 }
 0x16f   :  { %v171_v18 = vmul.f32 0.015625, %v169_v17  ;;  %v508_v17 = vld [vmem:[%s831_s12] ss:$0 sm:$0xff] }
 0x171   :  { %v172_v19 = vsub.f32 %v159_v12, %v171_v18 }
 0x173   :  { %v173_v20 = vmul.f32 %v172_v19, %v172_v19 }
 0x175   :  { %v174_v21 = vsel %vm166_vm1, %v173_v20, 0.0 }
 0x176   :  { %175 = vadd.xlane.f32.xlu0 %v174_v21 }
 0x1ff   :  { %v176_v26 = vpop.xlane.xlu0 %175 }
 0x200   :  { %v177_v27 = vmul.f32 0.015625, %v176_v26 }
 0x202   :  { %v178_v28 = vadd.f32 1e-05, %v177_v27 }
 0x204   :  { %595 = vrsqrt.f32 %v178_v28 }
 0x211   :  { %v596_v29 = vpop.eup %595 }
 0x212   :  { %v180_v31 = vmul.f32 %v596_v29, %v172_v19 }
 0x214   :  { %v187_v33 = vmul.f32 %v493_v30, %v180_v31 }
 0x216   :  { %v194_v34 = vadd.f32 %v494_v32, %v187_v33 }
 0x218   :  { %v195_v35 = vmax.f32 %v194_v34, 0.0 }
 0x21a   :  { %v196_v36 = vpack.c.bf16 %v195_v35, %v195_v35 }
 0x21c   :  { %560 = vmatmul.mubr.msk.bf16.vlgmr.msra.gmra.mxu1 %vm166_vm1, %v196_v36 }
 0x21d   :  { %567 = vmatprep.mubr.msk.bf16.mxu1 %vm624_vm0, %v623_v1  ;;  %564 = vmatpush3.bf16.msra.mxu1 %v592_v49 }
 0x21e   :  { %565 = vmatprep.subr.bf16.mxu1 %v623_v1 }
 0x221   :  { %566 = vmatpush3.bf16.msra.mxu1 %v593_v50 }
 0x222   :  { %571 = vmatprep.subr.bf16.mxu1 %v623_v1 }
 0x2dc   :  { %v273_v38 = vpop.f32.mrf.mxu1 }
 0x2dd   :  { %v274_v39 = vadd.f32 %v495_v37, %v273_v38 }
 0x2de   :  { %v561_v40 = vpop.f32.mrf.mxu1 }
 0x2df   :  { %v282_v41 = vsel %vm281_vm2, %v274_v39, 0.0 }
 0x2e0   :  { %283 = vadd.xlane.f32.xlu1 %v282_v41  ;;  %v276_v42 = vpop.f32.mrf.mxu1 }
 0x2e2   :  { %v562_v43 = vpop.f32.mrf.mxu1 }
 0x369   :  { %v284_v44 = vpop.xlane.xlu1 %283 }
 0x36a   :  { %v286_v45 = vmul.f32 0.03125, %v284_v44 }
 0x36c   :  { %v287_v46 = vsub.f32 %v274_v39, %v286_v45 }
 0x36e   :  { %v288_v47 = vmul.f32 %v287_v46, %v287_v46 }
 0x370   :  { %v289_v48 = vsel %vm281_vm2, %v288_v47, 0.0 }
 0x371   :  { %290 = vadd.xlane.f32.xlu1 %v289_v48 }
 0x3fa   :  { %v291_v51 = vpop.xlane.xlu1 %290 }
 0x3fb   :  { %v292_v52 = vmul.f32 0.03125, %v291_v51 }
 0x3fd   :  { %v293_v53 = vadd.f32 1e-05, %v292_v52 }
 0x3ff   :  { %597 = vrsqrt.f32 %v293_v53 }
 0x40c   :  { %v598_v54 = vpop.eup %597 }
 0x40d   :  { %v295_v56 = vmul.f32 %v598_v54, %v287_v46 }
 0x40f   :  { %v302_v58 = vmul.f32 %v501_v55, %v295_v56 }
 0x411   :  { %v309_v59 = vadd.f32 %v502_v57, %v302_v58 }
 0x413   :  { %v310_v60 = vmax.f32 %v309_v59, 0.0 }
 0x415   :  { %v311_v61 = vpack.c.bf16 %v310_v60, %v310_v60 }
 0x417   :  { %568 = vmatmul.mubr.msk.bf16.vlgmr.msra.gmra.mxu1 %vm281_vm2, %v311_v61 }
 0x418   :  { %573 = vmatprep.mubr.msk.bf16.mxu1 %vm624_vm0, %v623_v1  ;;  %v594_v1 = vld [vmem:[%s832_s13] sm:$0xff]  }
 0x419   :  { %572 = vmatpush3.bf16.msra.mxu1 %v594_v1 }
 0x4d7   :  { %v372_v63 = vpop.f32.mrf.mxu1 }
 0x4d8   :  { %v373_v0 = vadd.f32 %v503_v62, %v372_v63 }
 0x4d9   :  { %v569_v2 = vpop.f32.mrf.mxu1 }
 0x4da   :  { %v381_v3 = vsel %vm380_vm3, %v373_v0, 0.0 }
 0x4db   :  { %382 = vadd.xlane.f32.xlu0 %v381_v3  ;;  %v375_v4 = vpop.f32.mrf.mxu1 }
 0x4dd   :  { %v570_v5 = vpop.f32.mrf.mxu1 }
 0x564   :  { %v383_v6 = vpop.xlane.xlu0 %382 }
 0x565   :  { %v385_v7 = vmul.f32 0.0625, %v383_v6 }
 0x567   :  { %v386_v8 = vsub.f32 %v373_v0, %v385_v7 }
 0x569   :  { %v387_v9 = vmul.f32 %v386_v8, %v386_v8 }
 0x56b   :  { %v388_v10 = vsel %vm380_vm3, %v387_v9, 0.0 }
 0x56c   :  { %389 = vadd.xlane.f32.xlu1 %v388_v10 }
 0x5f5   :  { %v390_v11 = vpop.xlane.xlu1 %389 }
 0x5f6   :  { %v391_v12 = vmul.f32 0.0625, %v390_v11 }
 0x5f8   :  { %v392_v13 = vadd.f32 1e-05, %v391_v12 }
 0x5fa   :  { %599 = vrsqrt.f32 %v392_v13 }
 0x607   :  { %v600_v14 = vpop.eup %599 }
 0x608   :  { %v394_v16 = vmul.f32 %v600_v14, %v386_v8 }
 0x60a   :  { %v401_v18 = vmul.f32 %v507_v15, %v394_v16 }
 0x60c   :  { %v408_v19 = vadd.f32 %v508_v17, %v401_v18 }
 0x60e   :  { %v409_v20 = vmax.f32 %v408_v19, 0.0 }
 0x610   :  { %v410_v21 = vpack.c.bf16 %v409_v20, %v409_v20 }
 0x612   :  { %574 = vmatmul.mubr.msk.bf16.vlgmr.msra.gmra.mxu1 %vm380_vm3, %v410_v21 }
 0x6d2   :  { %v463_v23 = vpop.f32.mrf.mxu1 }
 0x6d3   :  { %v464_v24 = vadd.f32 %v509_v22, %v463_v23 }
 0x6d4   :  { %v575_v25 = vpop.f32.mrf.mxu1 }
 0x6d5   :  { %469 = vst [vmem:[#allocation2] sm:$0xff] %v464_v24 }
 0x6d6   :  { %v466_v26 = vpop.f32.mrf.mxu1 }
 0x6d7   :  { %612 = shalt.err (!%p609_p4)
}
 0x6d8   :  { %479 = dma.vmem_to_hbm [thread:$0]  %s477_s26, 128, %s834_s15, [#allocation3]   ;;  %v576_v27 = vpop.f32.mrf.mxu1 }
 0x6d9   :  { %621 = dma.done.wait [#allocation3], 128  }
 0x6da   :  { %622 = vsyncadd [#allocation3], 4294967168 }
 0x6db   :  { %483 = vsyncpa [#allocation3], 1 }

</bundles_post_ra>
